<compile_context>
chip_gen: v7x
topology: tpu7x:2x2x1
jax: 0.10.0
libtpu: 0.0.40
codegen_flags: <defaults>
</compile_context>

<pallas_src>
import jax
import jax.numpy as jnp
from jax.experimental import pallas as pl
from jax.experimental.pallas import tpu as pltpu

IN_CHANNELS = 4096  # fixed by the PyTorch module: nn.Conv2d(4096, 1, 1)


def _round_up(x, m):
    return ((x + m - 1) // m) * m


def _hw_budget():
    """(x-block byte cap, scoped-VMEM limit cap) chosen per TPU generation."""
    try:
        vmem_phys = pltpu.get_tpu_info().vmem_capacity_bytes
    except Exception:
        vmem_phys = 64 << 20                     # unknown -> v7x-safe defaults
    if vmem_phys >= (100 << 20):                 # v5e / v6e: 128 MiB physical VMEM
        return 16 << 20, 96 << 20                # 16 MiB x blocks, 96 MiB scoped cap
    return 8 << 20, 48 << 20                     # v7x: 64 MiB per TC


_X_BLOCK_CAP_BYTES, _VMEM_LIMIT_CAP_BYTES = _hw_budget()


# ----------------------------------------------------------------------------
# Kernels (both pure VPU multiply + reduce; no MXU, no reduction grid axis).
# ----------------------------------------------------------------------------

def _netd_rows_kernel(x_ref, w_ref, b_ref, o_ref):
    # Small-spatial path:  C is lane-dense.
    #   x_ref: (ROW_TILE, C) f32   rows = (n, h, w) positions
    #   w_ref: (1, C)        f32   resident weight row (constant block index)
    #   b_ref: (1, 1)        f32   SMEM bias
    #   o_ref: (ROW_TILE, 1) f32
    xw = x_ref[...] * w_ref[...]                              # VALU (sublane-bcast w)
    z = jnp.sum(xw, axis=-1, keepdims=True) + b_ref[0, 0]     # VALU tree + lane XLU
    # Sigmoid epilogue: exp on the EUP; exact reciprocal keeps the 1e-5 test
    # tolerance (pl.reciprocal(..., approx=True) is fine if ~1e-3 is enough).
    o_ref[...] = pl.reciprocal(1.0 + jnp.exp(-z), approx=False)


def _netd_chw_kernel(x_ref, w_ref, b_ref, o_ref):
    # Large-spatial path:  HW is lane-dense, native NCHW layout (no transpose).
    #   x_ref: (C, HW_TILE) f32   full channel extent (one image, one HW chunk)
    #   w_ref: (C, 1)       f32   resident weight column (constant block index)
    #   b_ref: (1, 1)       f32   SMEM bias
    #   o_ref: (1, HW_TILE) f32
    xw = x_ref[...] * w_ref[...]                              # VALU (lane-bcast w)
    z = jnp.sum(xw, axis=0, keepdims=True) + b_ref[0, 0]      # VALU tree + sublane XLU
    o_ref[...] = pl.reciprocal(1.0 + jnp.exp(-z), approx=False)


# ----------------------------------------------------------------------------
# Wrappers
# ----------------------------------------------------------------------------

def _forward_rows(x_rows, w_row, b_smem):
    """x_rows: (M, C) with C lane-dense.  Returns (M,)."""
    m, c = x_rows.shape
    row_cap = max(8, _X_BLOCK_CAP_BYTES // (c * 4))           # 512 (v7x) / 1024 (v5e/v6e)
    # >= 2 blocks on the parallel axis when M allows (v7x: 2 TensorCores).
    row_tile = min(row_cap, max(8, _round_up(pl.cdiv(m, 2), 8)))
    grid = (pl.cdiv(m, row_tile),)

    x_blk = row_tile * c * 4
    w_blk = 8 * c * 4                      # (1, C) pads sublanes to 8
    o_blk = row_tile * 128 * 4             # (ROW_TILE, 1) pads lanes to 128
    vmem_limit = min(3 * x_blk + 2 * w_blk + 4 * o_blk + (8 << 20),
                     _VMEM_LIMIT_CAP_BYTES)

    out = pl.pallas_call(
        _netd_rows_kernel,
        out_shape=jax.ShapeDtypeStruct((m, 1), jnp.float32),
        grid=grid,
        in_specs=[
            pl.BlockSpec((row_tile, c), lambda i: (i, 0)),
            pl.BlockSpec((1, c), lambda i: (0, 0)),            # resident weight
            pl.BlockSpec(memory_space=pltpu.MemorySpace.SMEM),  # bias scalar
        ],
        out_specs=pl.BlockSpec((row_tile, 1), lambda i: (i, 0)),
        compiler_params=pltpu.CompilerParams(
            dimension_semantics=("parallel",),
            vmem_limit_bytes=vmem_limit),
    )(x_rows, w_row, b_smem)
    return out.reshape(-1)


def _forward_chw(x_nc_hw, w_col, b_smem):
    """x_nc_hw: (N, C, HW), native NCHW-derived layout.  Returns (N*HW,)."""
    n, c, hw = x_nc_hw.shape
    hw_cap = max(128, _X_BLOCK_CAP_BYTES // (c * 4))          # 512 (v7x) / 1024 (v5e/v6e)
    if n >= 2:
        hw_tile = min(hw_cap, _round_up(hw, 128))
    else:
        # Single image: split HW into >= 2 blocks so both v7x TCs get work.
        hw_tile = min(hw_cap, max(128, _round_up(pl.cdiv(hw, 2), 128)))
    grid = (n, pl.cdiv(hw, hw_tile))

    x_blk = c * hw_tile * 4
    w_blk = c * 128 * 4                    # (C, 1) pads lanes to 128
    o_blk = 8 * hw_tile * 4                # (1, HW_TILE) pads sublanes to 8
    vmem_limit = min(3 * x_blk + 2 * w_blk + 4 * o_blk + (8 << 20),
                     _VMEM_LIMIT_CAP_BYTES)

    out = pl.pallas_call(
        _netd_chw_kernel,
        out_shape=jax.ShapeDtypeStruct((n, 1, hw), jnp.float32),
        grid=grid,
        in_specs=[
            pl.BlockSpec((None, c, hw_tile), lambda ni, ji: (ni, 0, ji)),
            pl.BlockSpec((c, 1), lambda ni, ji: (0, 0)),        # resident weight
            pl.BlockSpec(memory_space=pltpu.MemorySpace.SMEM),   # bias scalar
        ],
        out_specs=pl.BlockSpec((None, 1, hw_tile), lambda ni, ji: (ni, 0, ji)),
        compiler_params=pltpu.CompilerParams(
            dimension_semantics=("parallel", "parallel"),
            vmem_limit_bytes=vmem_limit),
    )(x_nc_hw, w_col, b_smem)
    return out.reshape(-1)


@jax.jit
def netd_forward(x_nchw, weight, bias):
    """Forward pass of _netD.

    x_nchw: (N, 4096, H, W) float32
    weight: (1, 4096, 1, 1) float32   (PyTorch Conv2d weight shape)
    bias:   (1,)            float32
    returns: (N*H*W,) float32  == sigmoid(conv1x1(x)).view(-1, 1).squeeze(1)
    """
    n, c, h, w = x_nchw.shape
    assert c == IN_CHANNELS
    hw = h * w

    x = x_nchw.astype(jnp.float32)
    w_flat = weight.reshape(-1).astype(jnp.float32)          # (4096,)
    b_smem = bias.reshape(1, 1).astype(jnp.float32)          # SMEM scalar

    if hw < 128:
        # Small-spatial fast path (the realistic DCGAN head: 1x1 .. 4x4).
        # Present C lane-dense as an (N*HW, C) slab: free reshape for hw == 1,
        # a one-off small XLA transpose otherwise -- far cheaper than
        # streaming lane-sparse (C, hw) tiles with hw*4-byte DMA runs.
        if hw == 1:
            x_rows = x.reshape(n, c)
        else:
            x_rows = jnp.transpose(x.reshape(n, c, hw), (0, 2, 1)).reshape(n * hw, c)
        return _forward_rows(x_rows, w_flat.reshape(1, c), b_smem)

    # Large-spatial path: no transpose; each (C, HW) image slab is contiguous
    # in HBM and is streamed with HW on the lane axis.
    return _forward_chw(x.reshape(n, c, hw), w_flat.reshape(c, 1), b_smem)


def _reference(x_nchw, weight, bias):
    # Pure-JAX reference: 1x1 conv == einsum over channels, then sigmoid.
    y = jnp.einsum("nchw,oc->nohw", x_nchw, weight.reshape(1, IN_CHANNELS),
                   precision=jax.lax.Precision.HIGHEST)
    y = y + bias.reshape(1, 1, 1, 1)
    return jax.nn.sigmoid(y).reshape(-1)


if __name__ == "__main__":
    key = jax.random.PRNGKey(0)
    k_x, k_w, k_b, k_x2 = jax.random.split(key, 4)

    C = IN_CHANNELS
    fan_in = C  # 1x1 kernel
    bound = 1.0 / (fan_in ** 0.5)
    weight = jax.random.uniform(k_w, (1, C, 1, 1), jnp.float32, -bound, bound)
    bias = jax.random.uniform(k_b, (1,), jnp.float32, -bound, bound)

    # 1) Realistic DCGAN-head shape: small spatial -> lane-dense rows path.
    N, H, W = 2, 2, 2
    x_small = jax.random.normal(k_x, (N, C, H, W), jnp.float32) * 0.05
    out = jax.block_until_ready(netd_forward(x_small, weight, bias))
    ref = _reference(x_small, weight, bias)
    assert out.shape == (N * H * W,), out.shape
    assert jnp.allclose(out, ref, atol=1e-5, rtol=1e-5), (
        float(jnp.max(jnp.abs(out - ref))))

    # 2) Large-spatial shape: exercises the no-transpose (C, HW) streaming path.
    N2, H2, W2 = 1, 16, 16
    x_large = jax.random.normal(k_x2, (N2, C, H2, W2), jnp.float32) * 0.05
    out2 = jax.block_until_ready(netd_forward(x_large, weight, bias))
    ref2 = _reference(x_large, weight, bias)
    assert out2.shape == (N2 * H2 * W2,), out2.shape
    assert jnp.allclose(out2, ref2, atol=1e-5, rtol=1e-5), (
        float(jnp.max(jnp.abs(out2 - ref2))))

    print("KERNEL_OK")
</pallas_src>

<mosaic_0001>
module attributes {stable_mosaic.version = 11 : i64} {
  func.func @_netd_rows_kernel(%arg0: i32, %arg1: memref<8x4096xf32, #tpu.memory_space<vmem>>, %arg2: memref<1x4096xf32, #tpu.memory_space<vmem>>, %arg3: memref<1x1xf32, #tpu.memory_space<smem>>, %arg4: memref<8x1xf32, #tpu.memory_space<vmem>>) attributes {dimension_semantics = [#tpu.dimension_semantics<parallel>], iteration_bounds = array<i64: 1>, scalar_prefetch = 0 : i64, scratch_operands = 0 : i64, tpu.core_type = #tpu.core_type<tc>, window_params = [{transform_indices = @transform_0, window_bounds = array<i64: 8, 4096>}, {pipeline_mode = #tpu.pipeline_mode<synchronous>, transform_indices = @transform_1, window_bounds = array<i64: 1, 4096>}, {transform_indices = @transform_2, window_bounds = array<i64: 1, 1>}, {transform_indices = @transform_3, window_bounds = array<i64: 8, 1>}]} {
    %c0 = arith.constant 0 : index
    %c0_0 = arith.constant 0 : index
    %0 = vector.load %arg1[%c0, %c0_0] : memref<8x4096xf32, #tpu.memory_space<vmem>>, vector<8x4096xf32>
    %c0_1 = arith.constant 0 : index
    %c0_2 = arith.constant 0 : index
    %1 = vector.load %arg2[%c0_1, %c0_2] : memref<1x4096xf32, #tpu.memory_space<vmem>>, vector<1x4096xf32>
    %2 = vector.broadcast %1 : vector<1x4096xf32> to vector<8x4096xf32>
    %3 = arith.mulf %0, %2 : vector<8x4096xf32>
    %cst = arith.constant dense<0.000000e+00> : vector<8xf32>
    %4 = vector.multi_reduction <add>, %3, %cst [1] : vector<8x4096xf32> to vector<8xf32>
    %5 = vector.shape_cast %4 : vector<8xf32> to vector<8x1xf32>
    %c0_3 = arith.constant 0 : index
    %c0_4 = arith.constant 0 : index
    %6 = memref.load %arg3[%c0_3, %c0_4] : memref<1x1xf32, #tpu.memory_space<smem>>
    %7 = vector.broadcast %6 : f32 to vector<8x1xf32>
    %8 = arith.addf %5, %7 : vector<8x1xf32>
    %cst_5 = arith.constant 0.000000e+00 : f32
    %9 = vector.broadcast %cst_5 : f32 to vector<8x1xf32>
    %10 = arith.subf %9, %8 : vector<8x1xf32>
    %11 = math.exp %10 : vector<8x1xf32>
    %cst_6 = arith.constant 1.000000e+00 : f32
    %12 = vector.broadcast %cst_6 : f32 to vector<8x1xf32>
    %13 = arith.addf %12, %11 : vector<8x1xf32>
    %14 = tpu.reciprocal %13 : vector<8x1xf32> -> vector<8x1xf32>
    %c0_7 = arith.constant 0 : index
    %c0_8 = arith.constant 0 : index
    %15 = vector.load %arg4[%c0_7, %c0_8] : memref<8x1xf32, #tpu.memory_space<vmem>>, vector<8x1xf32>
    tpu.vector_store %arg4[%c0_7, %c0_8], %14 {strides = array<i32>} : memref<8x1xf32, #tpu.memory_space<vmem>>, vector<8x1xf32>,
    return
  }
  func.func @transform_0(%arg0: i32) -> (i32, i32) {
    %c0_i32 = arith.constant 0 : i32
    %c0_i32_0 = arith.constant 0 : i32
    return %arg0, %c0_i32 : i32, i32
  }
  func.func @transform_1(%arg0: i32) -> (i32, i32) {
    %c0_i32 = arith.constant 0 : i32
    %c0_i32_0 = arith.constant 0 : i32
    %c0_i32_1 = arith.constant 0 : i32
    return %c0_i32, %c0_i32_0 : i32, i32
  }
  func.func @transform_2(%arg0: i32) -> (i32, i32) {
    %c0_i32 = arith.constant 0 : i32
    %c0_i32_0 = arith.constant 0 : i32
    %c0_i32_1 = arith.constant 0 : i32
    return %c0_i32, %c0_i32_0 : i32, i32
  }
  func.func @transform_3(%arg0: i32) -> (i32, i32) {
    %c0_i32 = arith.constant 0 : i32
    %c0_i32_0 = arith.constant 0 : i32
    return %arg0, %c0_i32 : i32, i32
  }
}

</mosaic_0001>

<bundles_post_ra>
// kernel: netd_forward.1
= control target key start
LH: loop header
LB: loop body
LE: loop exit
PB: predicated region body
PF: predicated region fallthrough
CT: control target
= control target key end

     0   :  { %v55_v0 = vlaneseq  ;;  %vm288_vm0 = vcmask 7168   ;;  %s480_s1 = inlined_call_operand.vmem [shape: f32[1,4096], index: 1, kind: input, shape index: {}]   ;;  %s481_s0 = inlined_call_operand.vmem [shape: f32[8,4096], index: 0, kind: input, shape index: {}]   ;;  %s482_s2 = inlined_call_operand.<no memory space> [shape: f32[1,1], index: 2, kind: input, shape index: {}]   ;;  %s483_s3 = inlined_call_operand.vmem [shape: f32[8,1], index: 3, kind: output, shape index: {}]  }
   0x1   :  { %v47_v4 = vld [vmem:[%s480_s1] sm:$0xff]  ;;  %v16_v10 = vld [vmem:[%s481_s0 + $0x8] sm:$0xff]  ;;  %v17_v13 = vld [vmem:[%s481_s0 + $0x10] sm:$0xff] }
   0x2   :  { %v56_v1 = vshrl.u32 %v55_v0, 7  ;;  %v15_v9 = vld [vmem:[%s481_s0] sm:$0xff]  ;;  %v18_v18 = vld [vmem:[%s481_s0 + $0x18] sm:$0xff]  ;;  %v20_v27 = vld [vmem:[%s481_s0 + $0x28] sm:$0xff] }
   0x3   :  { %v19_v22 = vld [vmem:[%s481_s0 + $0x20] sm:$0xff]  ;;  %v21_v31 = vld [vmem:[%s481_s0 + $0x30] sm:$0xff]  ;;  %v48_v32 = vld [vmem:[%s480_s1 + $0x8] sm:$0xff] }
   0x4   :  { %v318_v2 = vsub.s32 0, %v56_v1  ;;  %v320_v3 = vsub.s32 1, %v56_v1  ;;  %v325_v5 = vsub.s32 2, %v56_v1  ;;  %v329_v8 = vsub.s32 3, %v56_v1  ;;  %v22_v36 = vld [vmem:[%s481_s0 + $0x38] sm:$0xff]  ;;  %v23_v40 = vld [vmem:[%s481_s0 + $0x40] sm:$0xff] }
   0x5   :  { %v338_v12 = vsub.s32 4, %v56_v1  ;;  %v344_v15 = vsub.s32 5, %v56_v1  ;;  %v350_v20 = vsub.s32 6, %v56_v1  ;;  %v356_v24 = vsub.s32 7, %v56_v1  ;;  %v24_v44 = vld [vmem:[%s481_s0 + $0x48] sm:$0xff]  ;;  %v25_v48 = vld [vmem:[%s481_s0 + $0x50] sm:$0xff] }
   0x6   :  { %v58_v6 = vrot.slane %v47_v4, %v318_v2  ;;  %v62_v7 = vrot.slane %v47_v4, %v320_v3  ;;  %v66_v11 = vrot.slane %v47_v4, %v325_v5  ;;  %v70_v14 = vrot.slane %v47_v4, %v329_v8  ;;  %v26_v52 = vld [vmem:[%s481_s0 + $0x58] sm:$0xff]  ;;  %v27_v56 = vld [vmem:[%s481_s0 + $0x60] sm:$0xff]  ;;  %v28_v60 = vld [vmem:[%s481_s0 + $0x68] sm:$0xff] }
   0x7   :  { %v74_v19 = vrot.slane %v47_v4, %v338_v12  ;;  %v78_v23 = vrot.slane %v47_v4, %v344_v15  ;;  %v82_v28 = vrot.slane %v47_v4, %v350_v20  ;;  %v86_v33 = vrot.slane %v47_v4, %v356_v24  ;;  %v29_v0 = vld [vmem:[%s481_s0 + $0x70] sm:$0xff] }
   0x8   :  { %v215_v16 = vmul.f32 %v58_v6, %v15_v9  ;;  %v216_v17 = vmul.f32 %v62_v7, %v16_v10  ;;  %v217_v21 = vmul.f32 %v66_v11, %v17_v13  ;;  %v218_v25 = vmul.f32 %v70_v14, %v18_v18  ;;  %v49_v1 = vld [vmem:[%s480_s1 + $0x10] sm:$0xff]  ;;  %v30_v9 = vld [vmem:[%s481_s0 + $0x78] sm:$0xff]  ;;  %v31_v14 = vld [vmem:[%s481_s0 + $0x80] sm:$0xff] }
   0x9   :  { %v219_v29 = vmul.f32 %v74_v19, %v19_v22  ;;  %v220_v34 = vmul.f32 %v78_v23, %v20_v27  ;;  %v90_v37 = vrot.slane %v48_v32, %v318_v2  ;;  %v221_v38 = vmul.f32 %v82_v28, %v21_v31  ;;  %v32_v19 = vld [vmem:[%s481_s0 + $0x88] sm:$0xff] }
   0xa   :  { %v247_v26 = vadd.f32 %v216_v17, %v215_v16  ;;  %v94_v41 = vrot.slane %v48_v32, %v320_v3  ;;  %v222_v42 = vmul.f32 %v86_v33, %v22_v36  ;;  %v98_v45 = vrot.slane %v48_v32, %v325_v5  ;;  %v35_v33 = vld [vmem:[%s481_s0 + $0xa0] sm:$0xff] }
   0xb   :  { %v223_v46 = vmul.f32 %v90_v37, %v23_v40  ;;  %v102_v49 = vrot.slane %v48_v32, %v329_v8  ;;  %v106_v53 = vrot.slane %v48_v32, %v338_v12  ;;  %v110_v57 = vrot.slane %v48_v32, %v344_v15  ;;  %v36_v37 = vld [vmem:[%s481_s0 + $0xa8] sm:$0xff] }
   0xc   :  { %v248_v30 = vadd.f32 %v247_v26, %v217_v21  ;;  %v224_v50 = vmul.f32 %v94_v41, %v24_v44  ;;  %v225_v54 = vmul.f32 %v98_v45, %v25_v48  ;;  %v114_v61 = vrot.slane %v48_v32, %v350_v20  ;;  %v37_v41 = vld [vmem:[%s481_s0 + $0xb0] sm:$0xff] }
   0xd   :  { %v226_v58 = vmul.f32 %v102_v49, %v26_v52  ;;  %v227_v62 = vmul.f32 %v106_v53, %v27_v56  ;;  %v118_v4 = vrot.slane %v48_v32, %v356_v24  ;;  %v228_v6 = vmul.f32 %v110_v57, %v28_v60 }
   0xe   :  { %v249_v35 = vadd.f32 %v248_v30, %v218_v25  ;;  %v122_v10 = vrot.slane %v49_v1, %v318_v2  ;;  %v229_v11 = vmul.f32 %v114_v61, %v29_v0  ;;  %v126_v16 = vrot.slane %v49_v1, %v320_v3  ;;  %v33_v25 = vld [vmem:[%s481_s0 + $0x90] sm:$0xff] }
   0xf   :  { %v230_v17 = vmul.f32 %v118_v4, %v30_v9  ;;  %v130_v21 = vrot.slane %v49_v1, %v325_v5  ;;  %v134_v26 = vrot.slane %v49_v1, %v329_v8  ;;  %v138_v30 = vrot.slane %v49_v1, %v338_v12 }
  0x10   :  { %v250_v39 = vadd.f32 %v249_v35, %v219_v29  ;;  %v231_v22 = vmul.f32 %v122_v10, %v31_v14  ;;  %v232_v27 = vmul.f32 %v126_v16, %v32_v19  ;;  %v34_v29 = vld [vmem:[%s481_s0 + $0x98] sm:$0xff] }
  0x11   :  { %v233_v31 = vmul.f32 %v130_v21, %v33_v25  ;;  %v234_v35 = vmul.f32 %v134_v26, %v34_v29  ;;  %v281_v21 = vstv %s482_s2 }
  0x12   :  { %v251_v43 = vadd.f32 %v250_v39, %v220_v34  ;;  %v142_v34 = vrot.slane %v49_v1, %v344_v15  ;;  %v235_v39 = vmul.f32 %v138_v30, %v35_v33 }
  0x14   :  { %v252_v47 = vadd.f32 %v251_v43, %v221_v38  ;;  %v146_v38 = vrot.slane %v49_v1, %v350_v20  ;;  %v150_v43 = vrot.slane %v49_v1, %v356_v24  ;;  %v236_v44 = vmul.f32 %v142_v34, %v36_v37 }
  0x16   :  { %v253_v51 = vadd.f32 %v252_v47, %v222_v42  ;;  %v50_v42 = vld [vmem:[%s480_s1 + $0x18] sm:$0xff]  ;;  %v237_v48 = vmul.f32 %v146_v38, %v37_v41 }
  0x17   :  { %v154_v47 = vrot.slane %v50_v42, %v318_v2  ;;  %v41_v2 = vld [vmem:[%s481_s0 + $0xd0] sm:$0xff]  ;;  %v170_v61 = vrot.slane %v50_v42, %v338_v12  ;;  %v174_v0 = vrot.slane %v50_v42, %v344_v15  ;;  %v182_v10 = vrot.slane %v50_v42, %v356_v24  ;;  %v46_v15 = vld [vmem:[%s481_s0 + $0xf8] sm:$0xff] }
  0x18   :  { %v254_v55 = vadd.f32 %v253_v51, %v223_v46  ;;  %v38_v46 = vld [vmem:[%s481_s0 + $0xb8] sm:$0xff]  ;;  %v158_v51 = vrot.slane %v50_v42, %v320_v3  ;;  %v45_v12 = vld [vmem:[%s481_s0 + $0xf0] sm:$0xff] }
  0x19   :  { %v238_v52 = vmul.f32 %v150_v43, %v38_v46  ;;  %v42_v3 = vld [vmem:[%s481_s0 + $0xd8] sm:$0xff] }
  0x1a   :  { %v255_v59 = vadd.f32 %v254_v55, %v224_v50  ;;  %v39_v50 = vld [vmem:[%s481_s0 + $0xc0] sm:$0xff]  ;;  %v162_v55 = vrot.slane %v50_v42, %v325_v5 }
  0x1b   :  { %v239_v56 = vmul.f32 %v154_v47, %v39_v50  ;;  %v43_v5 = vld [vmem:[%s481_s0 + $0xe0] sm:$0xff] }
  0x1c   :  { %v256_v63 = vadd.f32 %v255_v59, %v225_v54  ;;  %v40_v54 = vld [vmem:[%s481_s0 + $0xc8] sm:$0xff] }
  0x1d   :  { %v240_v59 = vmul.f32 %v158_v51, %v40_v54 }
  0x1e   :  { %v257_v7 = vadd.f32 %v256_v63, %v226_v58  ;;  %v166_v58 = vrot.slane %v50_v42, %v329_v8  ;;  %v44_v8 = vld [vmem:[%s481_s0 + $0xe8] sm:$0xff] }
  0x20   :  { %v258_v13 = vadd.f32 %v257_v7, %v227_v62  ;;  %v241_v62 = vmul.f32 %v162_v55, %v41_v2  ;;  %v242_v1 = vmul.f32 %v166_v58, %v42_v3  ;;  %v243_v7 = vmul.f32 %v170_v61, %v43_v5 }
  0x22   :  { %v259_v18 = vadd.f32 %v258_v13, %v228_v6  ;;  %v178_v6 = vrot.slane %v50_v42, %v350_v20 }
  0x24   :  { %v260_v23 = vadd.f32 %v259_v18, %v229_v11  ;;  %v244_v11 = vmul.f32 %v174_v0, %v44_v8  ;;  %v245_v14 = vmul.f32 %v178_v6, %v45_v12 }
  0x26   :  { %v261_v28 = vadd.f32 %v260_v23, %v230_v17  ;;  %v246_v17 = vmul.f32 %v182_v10, %v46_v15 }
  0x28   :  { %v262_v32 = vadd.f32 %v261_v28, %v231_v22 }
  0x2a   :  { %v263_v36 = vadd.f32 %v262_v32, %v232_v27 }
  0x2c   :  { %v264_v40 = vadd.f32 %v263_v36, %v233_v31 }
  0x2e   :  { %v265_v45 = vadd.f32 %v264_v40, %v234_v35 }
  0x30   :  { %v266_v49 = vadd.f32 %v265_v45, %v235_v39 }
  0x32   :  { %v267_v53 = vadd.f32 %v266_v49, %v236_v44 }
  0x34   :  { %v268_v57 = vadd.f32 %v267_v53, %v237_v48 }
  0x36   :  { %v269_v60 = vadd.f32 %v268_v57, %v238_v52 }
  0x38   :  { %v270_v63 = vadd.f32 %v269_v60, %v239_v56 }
  0x3a   :  { %v271_v4 = vadd.f32 %v270_v63, %v240_v59 }
  0x3c   :  { %v272_v9 = vadd.f32 %v271_v4, %v241_v62 }
  0x3e   :  { %v273_v13 = vadd.f32 %v272_v9, %v242_v1 }
  0x40   :  { %v274_v16 = vadd.f32 %v273_v13, %v243_v7 }
  0x42   :  { %v275_v18 = vadd.f32 %v274_v16, %v244_v11 }
  0x44   :  { %v276_v19 = vadd.f32 %v275_v18, %v245_v14 }
  0x46   :  { %v277_v20 = vadd.f32 %v276_v19, %v246_v17 }
  0x48   :  { %278 = vadd.xlane.f32.xlu0 %v277_v20 }
  0xd5   :  { %v279_v22 = vpop.xlane.xlu0 %278 }
  0xd6   :  { %v282_v23 = vadd.f32 %v281_v21, %v279_v22 }
  0xd8   :  { %v283_v24 = vsub.f32 0.0, %v282_v23 }
  0xda   :  { %v284_v25 = vmul.f32 1.442695, %v283_v24 }
  0xdc   :  { %294 = vpow2.f32 %v284_v25 }
  0xe6   :  { %v295_v26 = vpop.eup %294 }
  0xe7   :  { %v286_v27 = vadd.f32 1.0, %v295_v26 }
  0xe9   :  { %296 = vrcp.f32 %v286_v27 }
  0xf3   :  { %v297_v28 = vpop.eup %296 }
  0xf4   :  { %289 = vst.msk [vmem:[%s483_s3] sm:$0xff] %vm288_vm0, %v297_v28 }

</bundles_post_ra>
